<compile_context>
chip_gen: v7x
topology: tpu7x:2x2x1
jax: 0.10.0
libtpu: 0.0.40
codegen_flags: <defaults>
</compile_context>

<pallas_src>
import functools

import numpy as np

import jax
import jax.numpy as jnp
from jax.experimental import pallas as pl
from jax.experimental.pallas import tpu as pltpu


def _round_up(x, n):
    return ((x + n - 1) // n) * n


def _pick_hidden_chunk(h_pad, max_chunk=1024):
    """Largest multiple of 128 that divides h_pad and is <= max_chunk."""
    if h_pad <= max_chunk:
        return h_pad
    for hk in range(max_chunk, 127, -128):
        if h_pad % hk == 0:
            return hk
    return 128  # h_pad is always a multiple of 128


def ffn_kernel(x_ref, w1_ref, b1_ref, w2_ref, b2_ref, o_ref, *, hk, n_chunks):
    # x_ref:  (tm, Dp)  bf16 tile of flattened tokens
    # w1_ref: (Dp, Hp) bf16, b1_ref: (1, Hp) f32
    # w2_ref: (Hp, Dp) bf16, b2_ref: (1, Dp) f32
    x = x_ref[...]
    acc = jnp.zeros((x_ref.shape[0], o_ref.shape[1]), jnp.float32)
    # Static unroll over hidden chunks keeps the f32 intermediate (tm, hk) bounded.
    for c in range(n_chunks):
        lo = c * hk
        w1c = w1_ref[:, lo:lo + hk]
        b1c = b1_ref[:, lo:lo + hk]
        h = jnp.dot(x, w1c, preferred_element_type=jnp.float32) + b1c
        h = jnp.maximum(h, 0.0)  # ReLU in f32
        # TODO(synk): nn.Dropout(p=0.1) is identity in eval/inference mode; training
        # time stochastic masking (pltpu.prng_random_bits) intentionally omitted.
        w2c = w2_ref[lo:lo + hk, :]
        acc = acc + jnp.dot(h.astype(w2c.dtype), w2c,
                            preferred_element_type=jnp.float32)
    o_ref[...] = (acc + b2_ref[...]).astype(o_ref.dtype)


def feed_forward(x, w1, b1, w2, b2, *, tm=512, matmul_dtype=jnp.bfloat16):
    """x: (batch, seq, input_dim). w1: (D, H), w2: (H, D) pre-transposed. Returns x.shape."""
    batch, seq, d_in = x.shape
    hidden = w1.shape[1]
    m = batch * seq

    # ---- lane-dense padding: last dims must be multiples of 128 -----------------
    d_pad = _round_up(d_in, 128)
    h_pad = _round_up(hidden, 128)

    # ---- adaptive row tile (multiple of 8, capped at token count) ---------------
    tm_eff = min(_round_up(tm, 8), _round_up(m, 8))
    # v7x has 2 TensorCores: keep >= 2 parallel grid steps when there is real work.
    if m > 256 and _round_up(m, tm_eff) // tm_eff < 2:
        tm_eff = _round_up((m + 1) // 2, 8)
    m_pad = _round_up(m, tm_eff)
    grid = (m_pad // tm_eff,)

    # ---- pad + cast operands (zero padding keeps the math exact) ----------------
    x2d = jnp.zeros((m_pad, d_pad), matmul_dtype).at[:m, :d_in].set(
        x.reshape(m, d_in).astype(matmul_dtype))
    w1p = jnp.zeros((d_pad, h_pad), matmul_dtype).at[:d_in, :hidden].set(
        w1.astype(matmul_dtype))
    w2p = jnp.zeros((h_pad, d_pad), matmul_dtype).at[:hidden, :d_in].set(
        w2.astype(matmul_dtype))
    b1p = jnp.zeros((1, h_pad), jnp.float32).at[0, :hidden].set(b1.astype(jnp.float32))
    b2p = jnp.zeros((1, d_pad), jnp.float32).at[0, :d_in].set(b2.astype(jnp.float32))

    hk = _pick_hidden_chunk(h_pad)
    n_chunks = h_pad // hk
    kernel = functools.partial(ffn_kernel, hk=hk, n_chunks=n_chunks)

    mm_bytes = np.dtype(matmul_dtype).itemsize
    out_bytes = np.dtype(x.dtype).itemsize
    # VMEM budget: resident single-buffered weights + double-buffered x/out tiles
    # + f32 hidden-chunk and accumulator temps. Raise the scoped limit accordingly.
    vmem_needed = (
        2 * d_pad * h_pad * mm_bytes           # W1 + W2 (single-buffered, resident)
        + (h_pad + d_pad) * 4                  # biases
        + 2 * tm_eff * d_pad * mm_bytes        # x tile (double-buffered)
        + 2 * tm_eff * d_pad * out_bytes       # out tile (double-buffered)
        + tm_eff * hk * 4                      # f32 hidden chunk
        + tm_eff * d_pad * 4)                  # f32 accumulator
    vmem_limit = int(min(max(2 * vmem_needed, 32 * 1024 * 1024), 100 * 1024 * 1024))

    cost = pl.CostEstimate(
        flops=2 * m_pad * (d_pad * h_pad + h_pad * d_pad),
        transcendentals=0,
        bytes_accessed=(m_pad * d_pad * mm_bytes          # x
                        + 2 * d_pad * h_pad * mm_bytes    # weights
                        + (h_pad + d_pad) * 4             # biases
                        + m_pad * d_pad * out_bytes))     # out

    def make_call(weight_mode):
        def const_spec(shape):
            # Grid-invariant operands: index_map constant across the grid.
            if weight_mode is None:
                return pl.BlockSpec(shape, lambda i: (0, 0))
            return pl.BlockSpec(shape, lambda i: (0, 0), pipeline_mode=weight_mode)

        return pl.pallas_call(
            kernel,
            out_shape=jax.ShapeDtypeStruct((m_pad, d_pad), x.dtype),
            grid_spec=pltpu.PrefetchScalarGridSpec(
                num_scalar_prefetch=0,
                grid=grid,
                in_specs=[
                    pl.BlockSpec((tm_eff, d_pad), lambda i: (i, 0)),  # x tile
                    const_spec((d_pad, h_pad)),                       # W1 (full)
                    const_spec((1, h_pad)),                           # b1
                    const_spec((h_pad, d_pad)),                       # W2 (full)
                    const_spec((1, d_pad)),                           # b2
                ],
                out_specs=pl.BlockSpec((tm_eff, d_pad), lambda i: (i, 0)),
            ),
            compiler_params=pltpu.CompilerParams(
                dimension_semantics=("parallel",),
                vmem_limit_bytes=vmem_limit),
            cost_estimate=cost,
        )

    args = (x2d, w1p, b1p, w2p, b2p)
    try:
        # Single-buffer the grid-invariant weights/biases to halve their VMEM cost.
        out2d = make_call(pl.Buffered(1))(*args)
    except Exception:
        # Fallback: default (double-buffered) pipelining if Buffered(1) is rejected.
        out2d = make_call(None)(*args)

    return out2d[:m, :d_in].reshape(batch, seq, d_in)


def init_params(key, input_dim, hidden_dim):
    """Deterministic init mimicking nn.Linear's U(-1/sqrt(fan_in), 1/sqrt(fan_in)).
    Weights are returned already transposed to (in, out)."""
    k1, k2, k3, k4 = jax.random.split(key, 4)
    bound1 = 1.0 / (input_dim ** 0.5)
    bound2 = 1.0 / (hidden_dim ** 0.5)
    w1 = jax.random.uniform(k1, (input_dim, hidden_dim), jnp.float32, -bound1, bound1)
    b1 = jax.random.uniform(k2, (hidden_dim,), jnp.float32, -bound1, bound1)
    w2 = jax.random.uniform(k3, (hidden_dim, input_dim), jnp.float32, -bound2, bound2)
    b2 = jax.random.uniform(k4, (input_dim,), jnp.float32, -bound2, bound2)
    return w1, b1, w2, b2


if __name__ == "__main__":
    batch, seq, input_dim, hidden_dim = 2, 8, 32, 64

    key = jax.random.PRNGKey(0)
    kx, kp = jax.random.split(key)
    x = jax.random.normal(kx, (batch, seq, input_dim), jnp.float32)
    w1, b1, w2, b2 = init_params(kp, input_dim, hidden_dim)

    out = feed_forward(x, w1, b1, w2, b2)
    jax.block_until_ready(out)
    assert out.shape == x.shape

    # Reference matching the kernel arithmetic (bf16 matmul inputs, f32 accumulate,
    # bias + ReLU in f32).
    x2 = x.reshape(-1, input_dim)
    h_ref = jnp.maximum(
        jnp.dot(x2.astype(jnp.bfloat16), w1.astype(jnp.bfloat16),
                preferred_element_type=jnp.float32) + b1, 0.0)
    ref_bf16 = (jnp.dot(h_ref.astype(jnp.bfloat16), w2.astype(jnp.bfloat16),
                        preferred_element_type=jnp.float32) + b2
                ).reshape(batch, seq, input_dim)
    assert jnp.allclose(out, ref_bf16, atol=2e-3, rtol=2e-3)

    # Full-f32 reference = the PyTorch module's eval-mode forward (dropout identity).
    ref_f32 = jnp.maximum(x @ w1 + b1, 0.0) @ w2 + b2
    assert jnp.allclose(out, ref_f32, atol=3e-2, rtol=3e-2)

    print("KERNEL_OK")
</pallas_src>

<mosaic_0001>
module attributes {stable_mosaic.version = 11 : i64} {
  func.func @ffn_kernel(%arg0: i32, %arg1: memref<16x128xbf16, #tpu.memory_space<vmem>>, %arg2: memref<128x128xbf16, #tpu.memory_space<vmem>>, %arg3: memref<1x128xf32, #tpu.memory_space<vmem>>, %arg4: memref<128x128xbf16, #tpu.memory_space<vmem>>, %arg5: memref<1x128xf32, #tpu.memory_space<vmem>>, %arg6: memref<16x128xf32, #tpu.memory_space<vmem>>) attributes {dimension_semantics = [#tpu.dimension_semantics<parallel>], iteration_bounds = array<i64: 1>, scalar_prefetch = 0 : i64, scratch_operands = 0 : i64, tpu.core_type = #tpu.core_type<tc>, window_params = [{transform_indices = @transform_0, window_bounds = array<i64: 16, 128>}, {pipeline_mode = #tpu.pipeline_mode<synchronous>, transform_indices = @transform_1, window_bounds = array<i64: 128, 128>}, {pipeline_mode = #tpu.pipeline_mode<synchronous>, transform_indices = @transform_2, window_bounds = array<i64: 1, 128>}, {pipeline_mode = #tpu.pipeline_mode<synchronous>, transform_indices = @transform_3, window_bounds = array<i64: 128, 128>}, {pipeline_mode = #tpu.pipeline_mode<synchronous>, transform_indices = @transform_4, window_bounds = array<i64: 1, 128>}, {transform_indices = @transform_5, window_bounds = array<i64: 16, 128>}]} {
    %c0 = arith.constant 0 : index
    %c0_0 = arith.constant 0 : index
    %0 = vector.load %arg1[%c0, %c0_0] : memref<16x128xbf16, #tpu.memory_space<vmem>>, vector<16x128xbf16>
    %cst = arith.constant 0.000000e+00 : f32
    %1 = vector.broadcast %cst : f32 to vector<16x128xf32>
    %c0_1 = arith.constant 0 : index
    %c0_2 = arith.constant 0 : index
    %2 = vector.load %arg2[%c0_1, %c0_2] : memref<128x128xbf16, #tpu.memory_space<vmem>>, vector<128x128xbf16>
    %c0_3 = arith.constant 0 : index
    %c0_4 = arith.constant 0 : index
    %3 = vector.load %arg3[%c0_3, %c0_4] : memref<1x128xf32, #tpu.memory_space<vmem>>, vector<1x128xf32>
    %cst_5 = arith.constant dense<0.000000e+00> : vector<16x128xf32>
    %4 = tpu.matmul %0, %2, %cst_5 {dimension_numbers = #tpu.dot_dimension_numbers<[1], [0], [0], [1], [0, 0, 1, 1], [], []>} : vector<16x128xbf16>, vector<128x128xbf16>, vector<16x128xf32> -> vector<16x128xf32>
    %5 = vector.broadcast %3 : vector<1x128xf32> to vector<16x128xf32>
    %6 = arith.addf %4, %5 : vector<16x128xf32>
    %cst_6 = arith.constant 0.000000e+00 : f32
    %7 = vector.broadcast %cst_6 : f32 to vector<16x128xf32>
    %8 = arith.maximumf %6, %7 : vector<16x128xf32>
    %c0_7 = arith.constant 0 : index
    %c0_8 = arith.constant 0 : index
    %9 = vector.load %arg4[%c0_7, %c0_8] : memref<128x128xbf16, #tpu.memory_space<vmem>>, vector<128x128xbf16>
    %10 = arith.truncf %8 : vector<16x128xf32> to vector<16x128xbf16>
    %cst_9 = arith.constant dense<0.000000e+00> : vector<16x128xf32>
    %11 = tpu.matmul %10, %9, %cst_9 {dimension_numbers = #tpu.dot_dimension_numbers<[1], [0], [0], [1], [0, 0, 1, 1], [], []>} : vector<16x128xbf16>, vector<128x128xbf16>, vector<16x128xf32> -> vector<16x128xf32>
    %12 = arith.addf %1, %11 : vector<16x128xf32>
    %c0_10 = arith.constant 0 : index
    %c0_11 = arith.constant 0 : index
    %13 = vector.load %arg5[%c0_10, %c0_11] : memref<1x128xf32, #tpu.memory_space<vmem>>, vector<1x128xf32>
    %14 = vector.broadcast %13 : vector<1x128xf32> to vector<16x128xf32>
    %15 = arith.addf %12, %14 : vector<16x128xf32>
    %c0_12 = arith.constant 0 : index
    %c0_13 = arith.constant 0 : index
    %16 = vector.load %arg6[%c0_12, %c0_13] : memref<16x128xf32, #tpu.memory_space<vmem>>, vector<16x128xf32>
    tpu.vector_store %arg6[%c0_12, %c0_13], %15 {strides = array<i32>} : memref<16x128xf32, #tpu.memory_space<vmem>>, vector<16x128xf32>,
    return
  }
  func.func @transform_0(%arg0: i32) -> (i32, i32) {
    %c0_i32 = arith.constant 0 : i32
    %c0_i32_0 = arith.constant 0 : i32
    return %arg0, %c0_i32 : i32, i32
  }
  func.func @transform_1(%arg0: i32) -> (i32, i32) {
    %c0_i32 = arith.constant 0 : i32
    %c0_i32_0 = arith.constant 0 : i32
    %c0_i32_1 = arith.constant 0 : i32
    return %c0_i32, %c0_i32_0 : i32, i32
  }
  func.func @transform_2(%arg0: i32) -> (i32, i32) {
    %c0_i32 = arith.constant 0 : i32
    %c0_i32_0 = arith.constant 0 : i32
    %c0_i32_1 = arith.constant 0 : i32
    return %c0_i32, %c0_i32_0 : i32, i32
  }
  func.func @transform_3(%arg0: i32) -> (i32, i32) {
    %c0_i32 = arith.constant 0 : i32
    %c0_i32_0 = arith.constant 0 : i32
    %c0_i32_1 = arith.constant 0 : i32
    return %c0_i32, %c0_i32_0 : i32, i32
  }
  func.func @transform_4(%arg0: i32) -> (i32, i32) {
    %c0_i32 = arith.constant 0 : i32
    %c0_i32_0 = arith.constant 0 : i32
    %c0_i32_1 = arith.constant 0 : i32
    return %c0_i32, %c0_i32_0 : i32, i32
  }
  func.func @transform_5(%arg0: i32) -> (i32, i32) {
    %c0_i32 = arith.constant 0 : i32
    %c0_i32_0 = arith.constant 0 : i32
    return %arg0, %c0_i32 : i32, i32
  }
}

module attributes {stable_mosaic.version = 11 : i64} {
  func.func @ffn_kernel(%arg0: i32, %arg1: memref<16x128xbf16, #tpu.memory_space<vmem>>, %arg2: memref<128x128xbf16, #tpu.memory_space<vmem>>, %arg3: memref<1x128xf32, #tpu.memory_space<vmem>>, %arg4: memref<128x128xbf16, #tpu.memory_space<vmem>>, %arg5: memref<1x128xf32, #tpu.memory_space<vmem>>, %arg6: memref<16x128xf32, #tpu.memory_space<vmem>>) attributes {dimension_semantics = [#tpu.dimension_semantics<parallel>], iteration_bounds = array<i64: 1>, scalar_prefetch = 0 : i64, scratch_operands = 0 : i64, tpu.core_type = #tpu.core_type<tc>, window_params = [{transform_indices = @transform_0, window_bounds = array<i64: 16, 128>}, {pipeline_mode = #tpu.pipeline_mode<synchronous>, transform_indices = @transform_1, window_bounds = array<i64: 128, 128>}, {pipeline_mode = #tpu.pipeline_mode<synchronous>, transform_indices = @transform_2, window_bounds = array<i64: 1, 128>}, {pipeline_mode = #tpu.pipeline_mode<synchronous>, transform_indices = @transform_3, window_bounds = array<i64: 128, 128>}, {pipeline_mode = #tpu.pipeline_mode<synchronous>, transform_indices = @transform_4, window_bounds = array<i64: 1, 128>}, {transform_indices = @transform_5, window_bounds = array<i64: 16, 128>}]} {
    %c0 = arith.constant 0 : index
    %c0_0 = arith.constant 0 : index
    %0 = vector.load %arg1[%c0, %c0_0] : memref<16x128xbf16, #tpu.memory_space<vmem>>, vector<16x128xbf16>
    %cst = arith.constant 0.000000e+00 : f32
    %1 = vector.broadcast %cst : f32 to vector<16x128xf32>
    %c0_1 = arith.constant 0 : index
    %c0_2 = arith.constant 0 : index
    %2 = vector.load %arg2[%c0_1, %c0_2] : memref<128x128xbf16, #tpu.memory_space<vmem>>, vector<128x128xbf16>
    %c0_3 = arith.constant 0 : index
    %c0_4 = arith.constant 0 : index
    %3 = vector.load %arg3[%c0_3, %c0_4] : memref<1x128xf32, #tpu.memory_space<vmem>>, vector<1x128xf32>
    %cst_5 = arith.constant dense<0.000000e+00> : vector<16x128xf32>
    %4 = tpu.matmul %0, %2, %cst_5 {dimension_numbers = #tpu.dot_dimension_numbers<[1], [0], [0], [1], [0, 0, 1, 1], [], []>} : vector<16x128xbf16>, vector<128x128xbf16>, vector<16x128xf32> -> vector<16x128xf32>
    %5 = vector.broadcast %3 : vector<1x128xf32> to vector<16x128xf32>
    %6 = arith.addf %4, %5 : vector<16x128xf32>
    %cst_6 = arith.constant 0.000000e+00 : f32
    %7 = vector.broadcast %cst_6 : f32 to vector<16x128xf32>
    %8 = arith.maximumf %6, %7 : vector<16x128xf32>
    %c0_7 = arith.constant 0 : index
    %c0_8 = arith.constant 0 : index
    %9 = vector.load %arg4[%c0_7, %c0_8] : memref<128x128xbf16, #tpu.memory_space<vmem>>, vector<128x128xbf16>
    %10 = arith.truncf %8 : vector<16x128xf32> to vector<16x128xbf16>
    %cst_9 = arith.constant dense<0.000000e+00> : vector<16x128xf32>
    %11 = tpu.matmul %10, %9, %cst_9 {dimension_numbers = #tpu.dot_dimension_numbers<[1], [0], [0], [1], [0, 0, 1, 1], [], []>} : vector<16x128xbf16>, vector<128x128xbf16>, vector<16x128xf32> -> vector<16x128xf32>
    %12 = arith.addf %1, %11 : vector<16x128xf32>
    %c0_10 = arith.constant 0 : index
    %c0_11 = arith.constant 0 : index
    %13 = vector.load %arg5[%c0_10, %c0_11] : memref<1x128xf32, #tpu.memory_space<vmem>>, vector<1x128xf32>
    %14 = vector.broadcast %13 : vector<1x128xf32> to vector<16x128xf32>
    %15 = arith.addf %12, %14 : vector<16x128xf32>
    %c0_12 = arith.constant 0 : index
    %c0_13 = arith.constant 0 : index
    %16 = vector.load %arg6[%c0_12, %c0_13] : memref<16x128xf32, #tpu.memory_space<vmem>>, vector<16x128xf32>
    tpu.vector_store %arg6[%c0_12, %c0_13], %15 {strides = array<i32>} : memref<16x128xf32, #tpu.memory_space<vmem>>, vector<16x128xf32>,
    return
  }
  func.func @transform_0(%arg0: i32) -> (i32, i32) {
    %c0_i32 = arith.constant 0 : i32
    %c0_i32_0 = arith.constant 0 : i32
    return %arg0, %c0_i32 : i32, i32
  }
  func.func @transform_1(%arg0: i32) -> (i32, i32) {
    %c0_i32 = arith.constant 0 : i32
    %c0_i32_0 = arith.constant 0 : i32
    %c0_i32_1 = arith.constant 0 : i32
    return %c0_i32, %c0_i32_0 : i32, i32
  }
  func.func @transform_2(%arg0: i32) -> (i32, i32) {
    %c0_i32 = arith.constant 0 : i32
    %c0_i32_0 = arith.constant 0 : i32
    %c0_i32_1 = arith.constant 0 : i32
    return %c0_i32, %c0_i32_0 : i32, i32
  }
  func.func @transform_3(%arg0: i32) -> (i32, i32) {
    %c0_i32 = arith.constant 0 : i32
    %c0_i32_0 = arith.constant 0 : i32
    %c0_i32_1 = arith.constant 0 : i32
    return %c0_i32, %c0_i32_0 : i32, i32
  }
  func.func @transform_4(%arg0: i32) -> (i32, i32) {
    %c0_i32 = arith.constant 0 : i32
    %c0_i32_0 = arith.constant 0 : i32
    %c0_i32_1 = arith.constant 0 : i32
    return %c0_i32, %c0_i32_0 : i32, i32
  }
  func.func @transform_5(%arg0: i32) -> (i32, i32) {
    %c0_i32 = arith.constant 0 : i32
    %c0_i32_0 = arith.constant 0 : i32
    return %arg0, %c0_i32 : i32, i32
  }
}

</mosaic_0001>

<bundles_post_ra>
// kernel: tpu_custom_call.1
= control target key start
LH: loop header
LB: loop body
LE: loop exit
PB: predicated region body
PF: predicated region fallthrough
CT: control target
= control target key end

     0   :  { %10 = vsyncpa [#allocation3], 0  ;;  %s626_s0 = inlined_call_operand.hbm [shape: bf16[16,128], index: 0, kind: input, shape index: {}]   ;;  %s627_s1 = inlined_call_operand.hbm [shape: bf16[128,128], index: 1, kind: input, shape index: {}]   ;;  %s628_s2 = inlined_call_operand.vmem [shape: f32[1,128], index: 2, kind: input, shape index: {}]   ;;  %s629_s3 = inlined_call_operand.hbm [shape: bf16[128,128], index: 3, kind: input, shape index: {}]   ;;  %s630_s4 = inlined_call_operand.vmem [shape: f32[1,128], index: 4, kind: input, shape index: {}]   ;;  %s631_s5 = inlined_call_operand.hbm [shape: f32[16,128], index: 5, kind: output, shape index: {}]  }
   0x1   :  { %11 = vsyncpa [#allocation6], 0 }
   0x2   :  { %12 = vsyncpa [#allocation4], 0  ;;  %s516_s18 = smov [#allocation5]   ;;  %s517_s20 = smov [#allocation2]  }
   0x3   :  { %s30_s19 = sshll.u32 %s516_s18, 4  ;;  %s18_s21 = sshll.u32 %s517_s20, 4  ;;  %s31_s19 = int_to_ptr.vmem [resolvable:$true] %s30_s19  ;;  %s556_s21 = int_to_ptr.vmem [resolvable:$true] %s18_s21 }
   0x4   :  { %s422_s24 = scalar_lea.hbm %s627_s1, 1024 }
   0x5   :  { %p423_p0 = scmp.ne.s32.totalorder %s627_s1, %s422_s24  ;;  %p426_p1 = scmp.lt.u32.totalorder %s422_s24, %s627_s1 }
   0x7   :  { %p428_p2 = pnand %p426_p1, %p423_p0 }
   0x9   :  { %431 = shalt.err (!%p428_p2)
}
   0xa   :  { %s432_s29 = scalar_lea.vmem %s31_s19, 1024  ;;  %p437_p4 = scmp.lt.s32.totalorder %s31_s19, %s31_s19 }
   0xb   :  { %p433_p3 = scmp.ne.s32.totalorder %s31_s19, %s432_s29  ;;  %p438_p5 = scmp.lt.s32.totalorder %s432_s29, %s432_s29 }
   0xd   :  { %p439_p6 = por %p438_p5, %p437_p4 }
   0xf   :  { %p440_p7 = pnand %p439_p6, %p433_p3 }
  0x11   :  { %443 = shalt.err (!%p440_p7)
}
  0x12   :  { %s518_s30 = smov 64   ;;  %s519_s6 = smov 4  }
  0x13   :  { %36 = dma.hbm_to_vmem [thread:$0]  %s627_s1, 1024, %s31_s19, [#allocation6], %s518_s30, %s518_s30, %s519_s6  }
  0x14   :  { %s444_s11 = scalar_lea.hbm %s626_s0, 128 }
  0x15   :  { %p445_p8 = scmp.ne.s32.totalorder %s626_s0, %s444_s11  ;;  %p448_p9 = scmp.lt.u32.totalorder %s444_s11, %s626_s0 }
  0x17   :  { %p450_p10 = pnand %p448_p9, %p445_p8 }
  0x19   :  { %453 = shalt.err (!%p450_p10)
}
  0x1a   :  { %s454_s16 = scalar_lea.vmem %s556_s21, 128  ;;  %p459_p12 = scmp.lt.s32.totalorder %s556_s21, %s556_s21 }
  0x1b   :  { %p455_p11 = scmp.ne.s32.totalorder %s556_s21, %s454_s16  ;;  %p460_p13 = scmp.lt.s32.totalorder %s454_s16, %s454_s16 }
  0x1d   :  { %p461_p0 = por %p460_p13, %p459_p12 }
  0x1f   :  { %p462_p1 = pnand %p461_p0, %p455_p11 }
  0x21   :  { %465 = shalt.err (!%p462_p1)
}
  0x22   :  { %24 = dma.hbm_to_vmem [thread:$0]  %s626_s0, 128, %s556_s21, [#allocation3], %s518_s30, %s518_s30, %s519_s6  }
  0x23   :  { %s520_s18 = smov [#allocation7]   ;;  %s466_s23 = scalar_lea.hbm %s629_s3, 1024 }
  0x24   :  { %s44_s19 = sshll.u32 %s520_s18, 4  ;;  %p467_p2 = scmp.ne.s32.totalorder %s629_s3, %s466_s23  ;;  %s45_s19 = int_to_ptr.vmem [resolvable:$true] %s44_s19 }
  0x25   :  { %p470_p3 = scmp.lt.u32.totalorder %s466_s23, %s629_s3 }
  0x27   :  { %p472_p4 = pnand %p470_p3, %p467_p2 }
  0x29   :  { %475 = shalt.err (!%p472_p4)
}
  0x2a   :  { %s476_s28 = scalar_lea.vmem %s45_s19, 1024  ;;  %p481_p6 = scmp.lt.s32.totalorder %s45_s19, %s45_s19 }
  0x2b   :  { %p477_p5 = scmp.ne.s32.totalorder %s45_s19, %s476_s28  ;;  %p482_p7 = scmp.lt.s32.totalorder %s476_s28, %s476_s28 }
  0x2d   :  { %p483_p8 = por %p482_p7, %p481_p6 }
  0x2f   :  { %p484_p9 = pnand %p483_p8, %p477_p5 }
  0x31   :  { %487 = shalt.err (!%p484_p9)
}
  0x32   :  { %50 = dma.hbm_to_vmem [thread:$0]  %s629_s3, 1024, %s45_s19, [#allocation6], %s518_s30, %s518_s30, %s519_s6  }
  0x33   :  { %510 = dma.done.wait [#allocation3], 128  }
  0x34   :  { %511 = vsyncadd [#allocation3], 4294967168 }
  0x35   :  { %512 = dma.done.wait [#allocation6], 2048  }
  0x36   :  { %513 = vsyncadd [#allocation6], 4294965248  ;;  %v521_v0 = vmov 0.0   ;;  %vm522_vm0 = vmmov 0   ;;  %v405_v1 = vld [vmem:[#allocation5] sm:$0xff]   ;;  %v406_v2 = vld [vmem:[#allocation5 + $0x8] sm:$0xff]  }
  0x37   :  { %355 = vmatprep.subr.bf16.mxu0 %v521_v0  ;;  %371 = vmatprep.mubr.msk.bf16.mxu0 %vm522_vm0, %v521_v0  ;;  %v407_v3 = vld [vmem:[#allocation5 + $0x10] sm:$0xff]   ;;  %v414_v4 = vld [vmem:[#allocation7] sm:$0xff]   ;;  %v408_v5 = vld [vmem:[#allocation5 + $0x18] sm:$0xff]   ;;  %s523_s7 = smov [#allocation8]  }
  0x38   :  { %375 = vmatprep.subr.bf16.mxu1 %v521_v0  ;;  %391 = vmatprep.mubr.msk.bf16.mxu1 %vm522_vm0, %v521_v0  ;;  %v415_v6 = vld [vmem:[#allocation7 + $0x8] sm:$0xff]   ;;  %v409_v7 = vld [vmem:[#allocation5 + $0x20] sm:$0xff]   ;;  %v416_v8 = vld [vmem:[#allocation7 + $0x10] sm:$0xff]   ;;  %s305_s8 = sshll.u32 %s523_s7, 4  ;;  %s306_s8 = int_to_ptr.vmem [resolvable:$true] %s305_s8 }
  0x39   :  { %356 = vmatpush3.bf16.msra.mxu0 %v405_v1  ;;  %376 = vmatpush3.bf16.msra.mxu1 %v414_v4  ;;  %v410_v9 = vld [vmem:[#allocation5 + $0x28] sm:$0xff]   ;;  %v417_v10 = vld [vmem:[#allocation7 + $0x18] sm:$0xff]   ;;  %v411_v11 = vld [vmem:[#allocation5 + $0x30] sm:$0xff]   ;;  %p493_p11 = scmp.lt.s32.totalorder %s306_s8, %s306_s8 }
  0x3a   :  { %357 = vmatprep.subr.bf16.mxu0 %v521_v0  ;;  %377 = vmatprep.subr.bf16.mxu1 %v521_v0  ;;  %v418_v12 = vld [vmem:[#allocation7 + $0x20] sm:$0xff]   ;;  %v412_v13 = vld [vmem:[#allocation5 + $0x38] sm:$0xff]   ;;  %v419_v14 = vld [vmem:[#allocation7 + $0x28] sm:$0xff]  }
  0x3b   :  { %v413_v15 = vld [vmem:[#allocation2] sm:$0xff]   ;;  %v420_v16 = vld [vmem:[#allocation7 + $0x30] sm:$0xff]  }
  0x3c   :  { %v421_v17 = vld [vmem:[#allocation7 + $0x38] sm:$0xff]  }
  0x3d   :  { %358 = vmatpush3.bf16.msra.mxu0 %v406_v2  ;;  %378 = vmatpush3.bf16.msra.mxu1 %v415_v6  ;;  %v318_v18 = vld [vmem:[%s628_s2] ss:$0 sm:$0xff]  ;;  %s488_s2 = scalar_lea.vmem %s306_s8, 256 }
  0x3e   :  { %359 = vmatprep.subr.bf16.mxu0 %v521_v0  ;;  %379 = vmatprep.subr.bf16.mxu1 %v521_v0  ;;  %v328_v28 = vld [vmem:[%s630_s4] ss:$0 sm:$0xff]  ;;  %p489_p10 = scmp.ne.s32.totalorder %s306_s8, %s488_s2  ;;  %p494_p12 = scmp.lt.s32.totalorder %s488_s2, %s488_s2 }
  0x40   :  { %p495_p13 = por %p494_p12, %p493_p11 }
  0x41   :  { %360 = vmatpush3.bf16.msra.mxu0 %v407_v3  ;;  %380 = vmatpush3.bf16.msra.mxu1 %v416_v8 }
  0x42   :  { %361 = vmatprep.subr.bf16.mxu0 %v521_v0  ;;  %381 = vmatprep.subr.bf16.mxu1 %v521_v0  ;;  %p496_p0 = pnand %p495_p13, %p489_p10 }
  0x45   :  { %362 = vmatpush3.bf16.msra.mxu0 %v408_v5  ;;  %382 = vmatpush3.bf16.msra.mxu1 %v417_v10 }
  0x46   :  { %363 = vmatprep.subr.bf16.mxu0 %v521_v0  ;;  %383 = vmatprep.subr.bf16.mxu1 %v521_v0 }
  0x49   :  { %364 = vmatpush3.bf16.msra.mxu0 %v409_v7  ;;  %384 = vmatpush3.bf16.msra.mxu1 %v418_v12 }
  0x4a   :  { %365 = vmatprep.subr.bf16.mxu0 %v521_v0  ;;  %385 = vmatprep.subr.bf16.mxu1 %v521_v0 }
  0x4d   :  { %366 = vmatpush3.bf16.msra.mxu0 %v410_v9  ;;  %386 = vmatpush3.bf16.msra.mxu1 %v419_v14 }
  0x4e   :  { %367 = vmatprep.subr.bf16.mxu0 %v521_v0  ;;  %387 = vmatprep.subr.bf16.mxu1 %v521_v0 }
  0x51   :  { %368 = vmatpush3.bf16.msra.mxu0 %v411_v11  ;;  %388 = vmatpush3.bf16.msra.mxu1 %v420_v16 }
  0x52   :  { %369 = vmatprep.subr.bf16.mxu0 %v521_v0  ;;  %389 = vmatprep.subr.bf16.mxu1 %v521_v0 }
  0x55   :  { %370 = vmatpush3.bf16.msra.mxu0 %v412_v13  ;;  %390 = vmatpush3.bf16.msra.mxu1 %v421_v17 }
  0x58   :  { %372 = vmatmul.mubr.bf16.vlgmr.msra.gmra.mrb[0].mxu0 %v413_v15 }
 0x12b   :  { %v176_v19 = vpop.f32.mrb[0].mxu0 }
 0x12c   :  { %v177_v20 = vadd.f32 %v318_v18, %v176_v19  ;;  %v373_v21 = vpop.f32.mrb[1].mxu0 }
 0x12d   :  { %v179_v22 = vpop.f32.mrb[2].mxu0 }
 0x12e   :  { %v180_v23 = vadd.f32 %v318_v18, %v179_v22  ;;  %v374_v24 = vpop.f32.mrb[3].mxu0  ;;  %v183_v25 = vmax.f32 %v177_v20, 0.0 }
 0x130   :  { %v184_v26 = vmax.f32 %v180_v23, 0.0 }
 0x132   :  { %v201_v27 = vpack.c.bf16 %v184_v26, %v183_v25 }
 0x134   :  { %392 = vmatmul.mubr.bf16.vlgmr.msra.gmra.mrb[0].mxu1 %v201_v27 }
 0x207   :  { %v291_v29 = vpop.f32.mrb[0].mxu1 }
 0x208   :  { %v292_v30 = vadd.f32 %v328_v28, %v291_v29  ;;  %v393_v31 = vpop.f32.mrb[1].mxu1 }
 0x209   :  { %v294_v32 = vpop.f32.mrb[2].mxu1 }
 0x20a   :  { %298 = vst [vmem:[#allocation8] sm:$0xff] %v292_v30  ;;  %v295_v33 = vadd.f32 %v328_v28, %v294_v32  ;;  %v394_v34 = vpop.f32.mrb[3].mxu1 }
 0x20c   :  { %299 = vst [vmem:[#allocation8 + $0x8] sm:$0xff] %v295_v33 }
 0x20d   :  { %499 = shalt.err (!%p496_p0)
}
 0x20e   :  { %s500_s10 = scalar_lea.hbm %s631_s5, 256 }
 0x20f   :  { %p501_p1 = scmp.ne.s32.totalorder %s631_s5, %s500_s10  ;;  %p504_p2 = scmp.lt.u32.totalorder %s500_s10, %s631_s5 }
 0x211   :  { %p506_p3 = pnand %p504_p2, %p501_p1 }
 0x213   :  { %509 = shalt.err (!%p506_p3)
}
 0x214   :  { %s524_s15 = smov 128   ;;  %s525_s16 = smov 8  }
 0x215   :  { %311 = dma.vmem_to_hbm [thread:$0]  %s306_s8, 256, %s631_s5, [#allocation4], %s524_s15, %s524_s15, %s525_s16  }
 0x216   :  { %514 = dma.done.wait [#allocation4], 256  }
 0x217   :  { %515 = vsyncadd [#allocation4], 4294967040 }
 0x218   :  { %315 = vsyncpa [#allocation3], 1 }
 0x219   :  { %316 = vsyncpa [#allocation6], 1 }
 0x21a   :  { %317 = vsyncpa [#allocation4], 1 }

// kernel: tpu_custom_call.1
= control target key start
LH: loop header
LB: loop body
LE: loop exit
PB: predicated region body
PF: predicated region fallthrough
CT: control target
= control target key end

     0   :  { %10 = vsyncpa [#allocation3], 0  ;;  %s626_s0 = inlined_call_operand.hbm [shape: bf16[16,128], index: 0, kind: input, shape index: {}]   ;;  %s627_s1 = inlined_call_operand.hbm [shape: bf16[128,128], index: 1, kind: input, shape index: {}]   ;;  %s628_s2 = inlined_call_operand.vmem [shape: f32[1,128], index: 2, kind: input, shape index: {}]   ;;  %s629_s3 = inlined_call_operand.hbm [shape: bf16[128,128], index: 3, kind: input, shape index: {}]   ;;  %s630_s4 = inlined_call_operand.vmem [shape: f32[1,128], index: 4, kind: input, shape index: {}]   ;;  %s631_s5 = inlined_call_operand.hbm [shape: f32[16,128], index: 5, kind: output, shape index: {}]  }
   0x1   :  { %11 = vsyncpa [#allocation6], 0 }
   0x2   :  { %12 = vsyncpa [#allocation4], 0  ;;  %s516_s18 = smov [#allocation5]   ;;  %s517_s20 = smov [#allocation2]  }
   0x3   :  { %s30_s19 = sshll.u32 %s516_s18, 4  ;;  %s18_s21 = sshll.u32 %s517_s20, 4  ;;  %s31_s19 = int_to_ptr.vmem [resolvable:$true] %s30_s19  ;;  %s556_s21 = int_to_ptr.vmem [resolvable:$true] %s18_s21 }
   0x4   :  { %s422_s24 = scalar_lea.hbm %s627_s1, 1024 }
   0x5   :  { %p423_p0 = scmp.ne.s32.totalorder %s627_s1, %s422_s24  ;;  %p426_p1 = scmp.lt.u32.totalorder %s422_s24, %s627_s1 }
   0x7   :  { %p428_p2 = pnand %p426_p1, %p423_p0 }
   0x9   :  { %431 = shalt.err (!%p428_p2)
}
   0xa   :  { %s432_s29 = scalar_lea.vmem %s31_s19, 1024  ;;  %p437_p4 = scmp.lt.s32.totalorder %s31_s19, %s31_s19 }
   0xb   :  { %p433_p3 = scmp.ne.s32.totalorder %s31_s19, %s432_s29  ;;  %p438_p5 = scmp.lt.s32.totalorder %s432_s29, %s432_s29 }
   0xd   :  { %p439_p6 = por %p438_p5, %p437_p4 }
   0xf   :  { %p440_p7 = pnand %p439_p6, %p433_p3 }
  0x11   :  { %443 = shalt.err (!%p440_p7)
}
  0x12   :  { %s518_s30 = smov 64   ;;  %s519_s6 = smov 4  }
  0x13   :  { %36 = dma.hbm_to_vmem [thread:$0]  %s627_s1, 1024, %s31_s19, [#allocation6], %s518_s30, %s518_s30, %s519_s6  }
  0x14   :  { %s444_s11 = scalar_lea.hbm %s626_s0, 128 }
  0x15   :  { %p445_p8 = scmp.ne.s32.totalorder %s626_s0, %s444_s11  ;;  %p448_p9 = scmp.lt.u32.totalorder %s444_s11, %s626_s0 }
  0x17   :  { %p450_p10 = pnand %p448_p9, %p445_p8 }
  0x19   :  { %453 = shalt.err (!%p450_p10)
}
  0x1a   :  { %s454_s16 = scalar_lea.vmem %s556_s21, 128  ;;  %p459_p12 = scmp.lt.s32.totalorder %s556_s21, %s556_s21 }
  0x1b   :  { %p455_p11 = scmp.ne.s32.totalorder %s556_s21, %s454_s16  ;;  %p460_p13 = scmp.lt.s32.totalorder %s454_s16, %s454_s16 }
  0x1d   :  { %p461_p0 = por %p460_p13, %p459_p12 }
  0x1f   :  { %p462_p1 = pnand %p461_p0, %p455_p11 }
  0x21   :  { %465 = shalt.err (!%p462_p1)
}
  0x22   :  { %24 = dma.hbm_to_vmem [thread:$0]  %s626_s0, 128, %s556_s21, [#allocation3], %s518_s30, %s518_s30, %s519_s6  }
  0x23   :  { %s520_s18 = smov [#allocation7]   ;;  %s466_s23 = scalar_lea.hbm %s629_s3, 1024 }
  0x24   :  { %s44_s19 = sshll.u32 %s520_s18, 4  ;;  %p467_p2 = scmp.ne.s32.totalorder %s629_s3, %s466_s23  ;;  %s45_s19 = int_to_ptr.vmem [resolvable:$true] %s44_s19 }
  0x25   :  { %p470_p3 = scmp.lt.u32.totalorder %s466_s23, %s629_s3 }
  0x27   :  { %p472_p4 = pnand %p470_p3, %p467_p2 }
  0x29   :  { %475 = shalt.err (!%p472_p4)
}
  0x2a   :  { %s476_s28 = scalar_lea.vmem %s45_s19, 1024  ;;  %p481_p6 = scmp.lt.s32.totalorder %s45_s19, %s45_s19 }
  0x2b   :  { %p477_p5 = scmp.ne.s32.totalorder %s45_s19, %s476_s28  ;;  %p482_p7 = scmp.lt.s32.totalorder %s476_s28, %s476_s28 }
  0x2d   :  { %p483_p8 = por %p482_p7, %p481_p6 }
  0x2f   :  { %p484_p9 = pnand %p483_p8, %p477_p5 }
  0x31   :  { %487 = shalt.err (!%p484_p9)
}
  0x32   :  { %50 = dma.hbm_to_vmem [thread:$0]  %s629_s3, 1024, %s45_s19, [#allocation6], %s518_s30, %s518_s30, %s519_s6  }
  0x33   :  { %510 = dma.done.wait [#allocation3], 128  }
  0x34   :  { %511 = vsyncadd [#allocation3], 4294967168 }
  0x35   :  { %512 = dma.done.wait [#allocation6], 2048  }
  0x36   :  { %513 = vsyncadd [#allocation6], 4294965248  ;;  %v521_v0 = vmov 0.0   ;;  %vm522_vm0 = vmmov 0   ;;  %v405_v1 = vld [vmem:[#allocation5] sm:$0xff]   ;;  %v406_v2 = vld [vmem:[#allocation5 + $0x8] sm:$0xff]  }
  0x37   :  { %355 = vmatprep.subr.bf16.mxu0 %v521_v0  ;;  %371 = vmatprep.mubr.msk.bf16.mxu0 %vm522_vm0, %v521_v0  ;;  %v407_v3 = vld [vmem:[#allocation5 + $0x10] sm:$0xff]   ;;  %v414_v4 = vld [vmem:[#allocation7] sm:$0xff]   ;;  %v408_v5 = vld [vmem:[#allocation5 + $0x18] sm:$0xff]   ;;  %s523_s7 = smov [#allocation8]  }
  0x38   :  { %375 = vmatprep.subr.bf16.mxu1 %v521_v0  ;;  %391 = vmatprep.mubr.msk.bf16.mxu1 %vm522_vm0, %v521_v0  ;;  %v415_v6 = vld [vmem:[#allocation7 + $0x8] sm:$0xff]   ;;  %v409_v7 = vld [vmem:[#allocation5 + $0x20] sm:$0xff]   ;;  %v416_v8 = vld [vmem:[#allocation7 + $0x10] sm:$0xff]   ;;  %s305_s8 = sshll.u32 %s523_s7, 4  ;;  %s306_s8 = int_to_ptr.vmem [resolvable:$true] %s305_s8 }
  0x39   :  { %356 = vmatpush3.bf16.msra.mxu0 %v405_v1  ;;  %376 = vmatpush3.bf16.msra.mxu1 %v414_v4  ;;  %v410_v9 = vld [vmem:[#allocation5 + $0x28] sm:$0xff]   ;;  %v417_v10 = vld [vmem:[#allocation7 + $0x18] sm:$0xff]   ;;  %v411_v11 = vld [vmem:[#allocation5 + $0x30] sm:$0xff]   ;;  %p493_p11 = scmp.lt.s32.totalorder %s306_s8, %s306_s8 }
  0x3a   :  { %357 = vmatprep.subr.bf16.mxu0 %v521_v0  ;;  %377 = vmatprep.subr.bf16.mxu1 %v521_v0  ;;  %v418_v12 = vld [vmem:[#allocation7 + $0x20] sm:$0xff]   ;;  %v412_v13 = vld [vmem:[#allocation5 + $0x38] sm:$0xff]   ;;  %v419_v14 = vld [vmem:[#allocation7 + $0x28] sm:$0xff]  }
  0x3b   :  { %v413_v15 = vld [vmem:[#allocation2] sm:$0xff]   ;;  %v420_v16 = vld [vmem:[#allocation7 + $0x30] sm:$0xff]  }
  0x3c   :  { %v421_v17 = vld [vmem:[#allocation7 + $0x38] sm:$0xff]  }
  0x3d   :  { %358 = vmatpush3.bf16.msra.mxu0 %v406_v2  ;;  %378 = vmatpush3.bf16.msra.mxu1 %v415_v6  ;;  %v318_v18 = vld [vmem:[%s628_s2] ss:$0 sm:$0xff]  ;;  %s488_s2 = scalar_lea.vmem %s306_s8, 256 }
  0x3e   :  { %359 = vmatprep.subr.bf16.mxu0 %v521_v0  ;;  %379 = vmatprep.subr.bf16.mxu1 %v521_v0  ;;  %v328_v28 = vld [vmem:[%s630_s4] ss:$0 sm:$0xff]  ;;  %p489_p10 = scmp.ne.s32.totalorder %s306_s8, %s488_s2  ;;  %p494_p12 = scmp.lt.s32.totalorder %s488_s2, %s488_s2 }
  0x40   :  { %p495_p13 = por %p494_p12, %p493_p11 }
  0x41   :  { %360 = vmatpush3.bf16.msra.mxu0 %v407_v3  ;;  %380 = vmatpush3.bf16.msra.mxu1 %v416_v8 }
  0x42   :  { %361 = vmatprep.subr.bf16.mxu0 %v521_v0  ;;  %381 = vmatprep.subr.bf16.mxu1 %v521_v0  ;;  %p496_p0 = pnand %p495_p13, %p489_p10 }
  0x45   :  { %362 = vmatpush3.bf16.msra.mxu0 %v408_v5  ;;  %382 = vmatpush3.bf16.msra.mxu1 %v417_v10 }
  0x46   :  { %363 = vmatprep.subr.bf16.mxu0 %v521_v0  ;;  %383 = vmatprep.subr.bf16.mxu1 %v521_v0 }
  0x49   :  { %364 = vmatpush3.bf16.msra.mxu0 %v409_v7  ;;  %384 = vmatpush3.bf16.msra.mxu1 %v418_v12 }
  0x4a   :  { %365 = vmatprep.subr.bf16.mxu0 %v521_v0  ;;  %385 = vmatprep.subr.bf16.mxu1 %v521_v0 }
  0x4d   :  { %366 = vmatpush3.bf16.msra.mxu0 %v410_v9  ;;  %386 = vmatpush3.bf16.msra.mxu1 %v419_v14 }
  0x4e   :  { %367 = vmatprep.subr.bf16.mxu0 %v521_v0  ;;  %387 = vmatprep.subr.bf16.mxu1 %v521_v0 }
  0x51   :  { %368 = vmatpush3.bf16.msra.mxu0 %v411_v11  ;;  %388 = vmatpush3.bf16.msra.mxu1 %v420_v16 }
  0x52   :  { %369 = vmatprep.subr.bf16.mxu0 %v521_v0  ;;  %389 = vmatprep.subr.bf16.mxu1 %v521_v0 }
  0x55   :  { %370 = vmatpush3.bf16.msra.mxu0 %v412_v13  ;;  %390 = vmatpush3.bf16.msra.mxu1 %v421_v17 }
  0x58   :  { %372 = vmatmul.mubr.bf16.vlgmr.msra.gmra.mrb[0].mxu0 %v413_v15 }
 0x12b   :  { %v176_v19 = vpop.f32.mrb[0].mxu0 }
 0x12c   :  { %v177_v20 = vadd.f32 %v318_v18, %v176_v19  ;;  %v373_v21 = vpop.f32.mrb[1].mxu0 }
 0x12d   :  { %v179_v22 = vpop.f32.mrb[2].mxu0 }
 0x12e   :  { %v180_v23 = vadd.f32 %v318_v18, %v179_v22  ;;  %v374_v24 = vpop.f32.mrb[3].mxu0  ;;  %v183_v25 = vmax.f32 %v177_v20, 0.0 }
 0x130   :  { %v184_v26 = vmax.f32 %v180_v23, 0.0 }
 0x132   :  { %v201_v27 = vpack.c.bf16 %v184_v26, %v183_v25 }
 0x134   :  { %392 = vmatmul.mubr.bf16.vlgmr.msra.gmra.mrb[0].mxu1 %v201_v27 }
 0x207   :  { %v291_v29 = vpop.f32.mrb[0].mxu1 }
 0x208   :  { %v292_v30 = vadd.f32 %v328_v28, %v291_v29  ;;  %v393_v31 = vpop.f32.mrb[1].mxu1 }
 0x209   :  { %v294_v32 = vpop.f32.mrb[2].mxu1 }
 0x20a   :  { %298 = vst [vmem:[#allocation8] sm:$0xff] %v292_v30  ;;  %v295_v33 = vadd.f32 %v328_v28, %v294_v32  ;;  %v394_v34 = vpop.f32.mrb[3].mxu1 }
 0x20c   :  { %299 = vst [vmem:[#allocation8 + $0x8] sm:$0xff] %v295_v33 }
 0x20d   :  { %499 = shalt.err (!%p496_p0)
}
 0x20e   :  { %s500_s10 = scalar_lea.hbm %s631_s5, 256 }
 0x20f   :  { %p501_p1 = scmp.ne.s32.totalorder %s631_s5, %s500_s10  ;;  %p504_p2 = scmp.lt.u32.totalorder %s500_s10, %s631_s5 }
 0x211   :  { %p506_p3 = pnand %p504_p2, %p501_p1 }
 0x213   :  { %509 = shalt.err (!%p506_p3)
}
 0x214   :  { %s524_s15 = smov 128   ;;  %s525_s16 = smov 8  }
 0x215   :  { %311 = dma.vmem_to_hbm [thread:$0]  %s306_s8, 256, %s631_s5, [#allocation4], %s524_s15, %s524_s15, %s525_s16  }
 0x216   :  { %514 = dma.done.wait [#allocation4], 256  }
 0x217   :  { %515 = vsyncadd [#allocation4], 4294967040 }
 0x218   :  { %315 = vsyncpa [#allocation3], 1 }
 0x219   :  { %316 = vsyncpa [#allocation6], 1 }
 0x21a   :  { %317 = vsyncpa [#allocation4], 1 }

</bundles_post_ra>
